<compile_context>
chip_gen: v7x
topology: tpu7x:2x2x1
jax: 0.10.0
libtpu: 0.0.40
codegen_flags: <defaults>
</compile_context>

<pallas_src>
import jax
import jax.numpy as jnp
import numpy as np
from jax import lax
from jax.experimental import pallas as pl
from jax.experimental.pallas import tpu as pltpu


def _rnn_kernel(ids_ref, h0_ref, wxp_ref, whh_t_ref, bias_ref, wy_t_ref, by_ref, out_ref):
    # Static shapes.
    SB = ids_ref.shape[0]            # seq * padded batch
    V, E = wxp_ref.shape             # vocab, embed
    Bp = h0_ref.shape[0]             # padded batch (multiple of 8 sublanes)
    S = SB // Bp                     # sequence length

    # ---- Fused embedding gather + input projection + bias: ONE MXU push ------------------
    # one_hot (SB, V) @ wx_proj (V, E), where wx_proj = wx_weight @ W_ih^T was folded in the
    # wrapper. The one-hot row-select is exact in f32.
    ids = ids_ref[...]                                            # (SB, 1) int32
    vocab_iota = lax.broadcasted_iota(jnp.int32, (SB, V), 1)
    one_hot = (vocab_iota == ids).astype(jnp.float32)             # (SB, V)
    xp = jnp.dot(one_hot, wxp_ref[...],
                 preferred_element_type=jnp.float32) + bias_ref[...]   # (SB, E), in registers

    # ---- Sequential recurrence: only h @ W_hh^T + tanh per step --------------------------
    # Static Python unroll; whh_t is loop-invariant so Mosaic can keep the RHS weight push
    # hoisted out of the chain. xp slices are static -> no VMEM scratch round-trip.
    whh_t = whh_t_ref[...]                                        # (E, E)
    h = h0_ref[...]                                               # (Bp, E)
    for t in range(S):
        h = jnp.tanh(
            jnp.dot(h, whh_t, preferred_element_type=jnp.float32)
            + xp[t * Bp:(t + 1) * Bp, :])

    # ---- Final vocab projection: single full-tile lane-dense (Bp, V) store ---------------
    out_ref[...] = (jnp.dot(h, wy_t_ref[...], preferred_element_type=jnp.float32)
                    + by_ref[...]).astype(out_ref.dtype)


@jax.jit
def torch_rnn_forward(inputs, h0, wx_weight, w_ih, w_hh, b_ih, b_hh, wy_weight, wy_bias):
    """inputs: (S, B) int32 token ids; h0: (num_layers=1, B, E) initial hidden state."""
    S, B = inputs.shape
    V, E = wx_weight.shape
    B_pad = int(-(-B // 8) * 8)      # round batch up to the native 8-sublane height

    # Glue (trace-time, weight-only / tiny):
    #   * clamp ids (match jnp.take / valid-id Embedding semantics), pad batch, flatten.
    #   * fold embedding into the input projection: wx_proj = wx @ W_ih^T  (V, E).
    #   * pre-sum the two RNN biases, transpose weights so the kernel does plain x @ W.
    ids = jnp.clip(inputs, 0, V - 1).astype(jnp.int32)
    ids = jnp.pad(ids, ((0, 0), (0, B_pad - B)))                  # (S, B_pad), pad with token 0
    ids = ids.reshape(S * B_pad, 1)                               # row t*B_pad + b == (t, b)

    h0_2d = jnp.pad(h0[0], ((0, B_pad - B), (0, 0)))              # (B_pad, E)

    wx_proj = jnp.dot(wx_weight, w_ih.T,
                      precision=lax.Precision.HIGHEST)            # (V, E) folded embed+proj
    whh_t = w_hh.T                                                # (E, E)
    bias = (b_ih + b_hh).reshape(1, E)                            # pre-summed RNN bias
    wy_t = wy_weight.T                                            # (E, V)
    by = wy_bias.reshape(1, V)

    flops = 2 * S * B_pad * V * E + 2 * S * B_pad * E * E + 2 * B_pad * E * V
    bytes_accessed = 4 * (S * B_pad + B_pad * E + V * E + E * E + E + E * V + V + B_pad * V)

    vmem_spec = pl.BlockSpec(memory_space=pltpu.MemorySpace.VMEM)

    out_pad = pl.pallas_call(
        _rnn_kernel,
        out_shape=jax.ShapeDtypeStruct((B_pad, V), jnp.float32),
        in_specs=[vmem_spec] * 7,
        out_specs=vmem_spec,
        cost_estimate=pl.CostEstimate(flops=flops,
                                      transcendentals=S * B_pad * E,
                                      bytes_accessed=bytes_accessed),
    )(ids, h0_2d, wx_proj, whh_t, bias, wy_t, by)

    return out_pad[:B]


def reference_forward(inputs, h0, wx_weight, w_ih, w_hh, b_ih, b_hh, wy_weight, wy_bias):
    embeds = jnp.take(wx_weight, inputs, axis=0)
    h = h0[0]
    for t in range(inputs.shape[0]):
        h = jnp.tanh(embeds[t] @ w_ih.T + b_ih + h @ w_hh.T + b_hh)
    return h @ wy_weight.T + wy_bias


if __name__ == "__main__":
    # Module hyper-params (synthetic, deterministic init).
    num_vocab = 128          # keep V a multiple of 128 -> lane-dense logits store
    embed_size = 32
    batch_size = 4
    seq_len = 8
    num_layers = 1
    embed_init_range = 0.1

    key = jax.random.PRNGKey(0)
    k_wx, k_wy, k_wih, k_whh, k_bih, k_bhh, k_in = jax.random.split(key, 7)

    # Embedding / output-projection init mirrors init_weights(): uniform(-r, r), bias = 0.
    wx_weight = jax.random.uniform(k_wx, (num_vocab, embed_size), jnp.float32,
                                   -embed_init_range, embed_init_range)
    wy_weight = jax.random.uniform(k_wy, (num_vocab, embed_size), jnp.float32,
                                   -embed_init_range, embed_init_range)
    wy_bias = jnp.zeros((num_vocab,), jnp.float32)

    # RNN weights use PyTorch's default uniform(-1/sqrt(H), 1/sqrt(H)).
    k = 1.0 / np.sqrt(embed_size)
    w_ih = jax.random.uniform(k_wih, (embed_size, embed_size), jnp.float32, -k, k)
    w_hh = jax.random.uniform(k_whh, (embed_size, embed_size), jnp.float32, -k, k)
    b_ih = jax.random.uniform(k_bih, (embed_size,), jnp.float32, -k, k)
    b_hh = jax.random.uniform(k_bhh, (embed_size,), jnp.float32, -k, k)

    # Inputs: (seq, batch) token ids; hidden: zeros like init_hidden().
    inputs = jax.random.randint(k_in, (seq_len, batch_size), 0, num_vocab, jnp.int32)
    h0 = jnp.zeros((num_layers, batch_size, embed_size), jnp.float32)

    logits = torch_rnn_forward(inputs, h0, wx_weight, w_ih, w_hh, b_ih, b_hh,
                               wy_weight, wy_bias)
    logits = jax.block_until_ready(logits)

    ref = reference_forward(inputs, h0, wx_weight, w_ih, w_hh, b_ih, b_hh,
                            wy_weight, wy_bias)
    np.testing.assert_allclose(np.asarray(logits), np.asarray(ref),
                               rtol=1e-5, atol=1e-5)

    print("KERNEL_OK")
</pallas_src>

<mosaic_0001>
module attributes {stable_mosaic.version = 11 : i64} {
  func.func @_rnn_kernel(%arg0: memref<64x1xi32, #tpu.memory_space<vmem>>, %arg1: memref<8x32xf32, #tpu.memory_space<vmem>>, %arg2: memref<128x32xf32, #tpu.memory_space<vmem>>, %arg3: memref<32x32xf32, #tpu.memory_space<vmem>>, %arg4: memref<1x32xf32, #tpu.memory_space<vmem>>, %arg5: memref<32x128xf32, #tpu.memory_space<vmem>>, %arg6: memref<1x128xf32, #tpu.memory_space<vmem>>, %arg7: memref<8x128xf32, #tpu.memory_space<vmem>>) attributes {dimension_semantics = [], scalar_prefetch = 0 : i64, scratch_operands = 0 : i64, tpu.core_type = #tpu.core_type<tc>} {
    %c0 = arith.constant 0 : index
    %c0_0 = arith.constant 0 : index
    %0 = vector.load %arg0[%c0, %c0_0] : memref<64x1xi32, #tpu.memory_space<vmem>>, vector<64x1xi32>
    %1 = tpu.iota {dimensions = array<i32: 1>} : vector<64x128xi32>
    %2 = vector.broadcast %0 : vector<64x1xi32> to vector<64x128xi32>
    %3 = arith.cmpi eq, %1, %2 : vector<64x128xi32>
    %4 = arith.extui %3 : vector<64x128xi1> to vector<64x128xi32>
    %5 = arith.sitofp %4 : vector<64x128xi32> to vector<64x128xf32>
    %c0_1 = arith.constant 0 : index
    %c0_2 = arith.constant 0 : index
    %6 = vector.load %arg2[%c0_1, %c0_2] : memref<128x32xf32, #tpu.memory_space<vmem>>, vector<128x32xf32>
    %cst = arith.constant dense<0.000000e+00> : vector<64x32xf32>
    %7 = tpu.matmul %5, %6, %cst {dimension_numbers = #tpu.dot_dimension_numbers<[1], [0], [0], [1], [0, 0, 1, 1], [], []>} : vector<64x128xf32>, vector<128x32xf32>, vector<64x32xf32> -> vector<64x32xf32>
    %c0_3 = arith.constant 0 : index
    %c0_4 = arith.constant 0 : index
    %8 = vector.load %arg4[%c0_3, %c0_4] : memref<1x32xf32, #tpu.memory_space<vmem>>, vector<1x32xf32>
    %9 = vector.broadcast %8 : vector<1x32xf32> to vector<64x32xf32>
    %10 = arith.addf %7, %9 : vector<64x32xf32>
    %c0_5 = arith.constant 0 : index
    %c0_6 = arith.constant 0 : index
    %11 = vector.load %arg3[%c0_5, %c0_6] : memref<32x32xf32, #tpu.memory_space<vmem>>, vector<32x32xf32>
    %c0_7 = arith.constant 0 : index
    %c0_8 = arith.constant 0 : index
    %12 = vector.load %arg1[%c0_7, %c0_8] : memref<8x32xf32, #tpu.memory_space<vmem>>, vector<8x32xf32>
    %cst_9 = arith.constant dense<0.000000e+00> : vector<8x32xf32>
    %13 = tpu.matmul %12, %11, %cst_9 {dimension_numbers = #tpu.dot_dimension_numbers<[1], [0], [0], [1], [0, 0, 1, 1], [], []>} : vector<8x32xf32>, vector<32x32xf32>, vector<8x32xf32> -> vector<8x32xf32>
    %14 = vector.extract_strided_slice %10 {offsets = [0, 0], sizes = [8, 32], strides = [1, 1]} : vector<64x32xf32> to vector<8x32xf32>
    %15 = arith.addf %13, %14 : vector<8x32xf32>
    %16 = math.tanh %15 : vector<8x32xf32>
    %cst_10 = arith.constant dense<0.000000e+00> : vector<8x32xf32>
    %17 = tpu.matmul %16, %11, %cst_10 {dimension_numbers = #tpu.dot_dimension_numbers<[1], [0], [0], [1], [0, 0, 1, 1], [], []>} : vector<8x32xf32>, vector<32x32xf32>, vector<8x32xf32> -> vector<8x32xf32>
    %18 = vector.extract_strided_slice %10 {offsets = [8, 0], sizes = [8, 32], strides = [1, 1]} : vector<64x32xf32> to vector<8x32xf32>
    %19 = arith.addf %17, %18 : vector<8x32xf32>
    %20 = math.tanh %19 : vector<8x32xf32>
    %cst_11 = arith.constant dense<0.000000e+00> : vector<8x32xf32>
    %21 = tpu.matmul %20, %11, %cst_11 {dimension_numbers = #tpu.dot_dimension_numbers<[1], [0], [0], [1], [0, 0, 1, 1], [], []>} : vector<8x32xf32>, vector<32x32xf32>, vector<8x32xf32> -> vector<8x32xf32>
    %22 = vector.extract_strided_slice %10 {offsets = [16, 0], sizes = [8, 32], strides = [1, 1]} : vector<64x32xf32> to vector<8x32xf32>
    %23 = arith.addf %21, %22 : vector<8x32xf32>
    %24 = math.tanh %23 : vector<8x32xf32>
    %cst_12 = arith.constant dense<0.000000e+00> : vector<8x32xf32>
    %25 = tpu.matmul %24, %11, %cst_12 {dimension_numbers = #tpu.dot_dimension_numbers<[1], [0], [0], [1], [0, 0, 1, 1], [], []>} : vector<8x32xf32>, vector<32x32xf32>, vector<8x32xf32> -> vector<8x32xf32>
    %26 = vector.extract_strided_slice %10 {offsets = [24, 0], sizes = [8, 32], strides = [1, 1]} : vector<64x32xf32> to vector<8x32xf32>
    %27 = arith.addf %25, %26 : vector<8x32xf32>
    %28 = math.tanh %27 : vector<8x32xf32>
    %cst_13 = arith.constant dense<0.000000e+00> : vector<8x32xf32>
    %29 = tpu.matmul %28, %11, %cst_13 {dimension_numbers = #tpu.dot_dimension_numbers<[1], [0], [0], [1], [0, 0, 1, 1], [], []>} : vector<8x32xf32>, vector<32x32xf32>, vector<8x32xf32> -> vector<8x32xf32>
    %30 = vector.extract_strided_slice %10 {offsets = [32, 0], sizes = [8, 32], strides = [1, 1]} : vector<64x32xf32> to vector<8x32xf32>
    %31 = arith.addf %29, %30 : vector<8x32xf32>
    %32 = math.tanh %31 : vector<8x32xf32>
    %cst_14 = arith.constant dense<0.000000e+00> : vector<8x32xf32>
    %33 = tpu.matmul %32, %11, %cst_14 {dimension_numbers = #tpu.dot_dimension_numbers<[1], [0], [0], [1], [0, 0, 1, 1], [], []>} : vector<8x32xf32>, vector<32x32xf32>, vector<8x32xf32> -> vector<8x32xf32>
    %34 = vector.extract_strided_slice %10 {offsets = [40, 0], sizes = [8, 32], strides = [1, 1]} : vector<64x32xf32> to vector<8x32xf32>
    %35 = arith.addf %33, %34 : vector<8x32xf32>
    %36 = math.tanh %35 : vector<8x32xf32>
    %cst_15 = arith.constant dense<0.000000e+00> : vector<8x32xf32>
    %37 = tpu.matmul %36, %11, %cst_15 {dimension_numbers = #tpu.dot_dimension_numbers<[1], [0], [0], [1], [0, 0, 1, 1], [], []>} : vector<8x32xf32>, vector<32x32xf32>, vector<8x32xf32> -> vector<8x32xf32>
    %38 = vector.extract_strided_slice %10 {offsets = [48, 0], sizes = [8, 32], strides = [1, 1]} : vector<64x32xf32> to vector<8x32xf32>
    %39 = arith.addf %37, %38 : vector<8x32xf32>
    %40 = math.tanh %39 : vector<8x32xf32>
    %cst_16 = arith.constant dense<0.000000e+00> : vector<8x32xf32>
    %41 = tpu.matmul %40, %11, %cst_16 {dimension_numbers = #tpu.dot_dimension_numbers<[1], [0], [0], [1], [0, 0, 1, 1], [], []>} : vector<8x32xf32>, vector<32x32xf32>, vector<8x32xf32> -> vector<8x32xf32>
    %42 = vector.extract_strided_slice %10 {offsets = [56, 0], sizes = [8, 32], strides = [1, 1]} : vector<64x32xf32> to vector<8x32xf32>
    %43 = arith.addf %41, %42 : vector<8x32xf32>
    %44 = math.tanh %43 : vector<8x32xf32>
    %c0_17 = arith.constant 0 : index
    %c0_18 = arith.constant 0 : index
    %45 = vector.load %arg5[%c0_17, %c0_18] : memref<32x128xf32, #tpu.memory_space<vmem>>, vector<32x128xf32>
    %cst_19 = arith.constant dense<0.000000e+00> : vector<8x128xf32>
    %46 = tpu.matmul %44, %45, %cst_19 {dimension_numbers = #tpu.dot_dimension_numbers<[1], [0], [0], [1], [0, 0, 1, 1], [], []>} : vector<8x32xf32>, vector<32x128xf32>, vector<8x128xf32> -> vector<8x128xf32>
    %c0_20 = arith.constant 0 : index
    %c0_21 = arith.constant 0 : index
    %47 = vector.load %arg6[%c0_20, %c0_21] : memref<1x128xf32, #tpu.memory_space<vmem>>, vector<1x128xf32>
    %48 = vector.broadcast %47 : vector<1x128xf32> to vector<8x128xf32>
    %49 = arith.addf %46, %48 : vector<8x128xf32>
    %c0_22 = arith.constant 0 : index
    %c0_23 = arith.constant 0 : index
    %50 = vector.load %arg7[%c0_22, %c0_23] : memref<8x128xf32, #tpu.memory_space<vmem>>, vector<8x128xf32>
    tpu.vector_store %arg7[%c0_22, %c0_23], %49 {strides = array<i32>} : memref<8x128xf32, #tpu.memory_space<vmem>>, vector<8x128xf32>,
    return
  }
}

</mosaic_0001>

<bundles_post_ra>
// kernel: torch_rnn_forward.1
= control target key start
LH: loop header
LB: loop body
LE: loop exit
PB: predicated region body
PF: predicated region fallthrough
CT: control target
= control target key end

     0   :  { %v1247_v0 = vmov 0   ;;  %v1248_v7 = vmov 0.0|0.0   ;;  %vm1249_vm0 = vmmov 0   ;;  %v1250_v18 = vmov 0.0   ;;  %s1475_s0 = inlined_call_operand.vmem [shape: s32[64,1], index: 0, kind: input, shape index: {}]   ;;  %s1476_s2 = inlined_call_operand.vmem [shape: f32[128,32], index: 2, kind: input, shape index: {}]   ;;  %s1477_s3 = inlined_call_operand.vmem [shape: f32[32,32], index: 3, kind: input, shape index: {}]   ;;  %s1478_s1 = inlined_call_operand.vmem [shape: f32[8,32], index: 1, kind: input, shape index: {}]   ;;  %s1479_s4 = inlined_call_operand.vmem [shape: f32[1,32], index: 4, kind: input, shape index: {}]   ;;  %s1480_s5 = inlined_call_operand.vmem [shape: f32[32,128], index: 5, kind: input, shape index: {}]   ;;  %s1481_s6 = inlined_call_operand.vmem [shape: f32[1,128], index: 6, kind: input, shape index: {}]   ;;  %s1482_s7 = inlined_call_operand.vmem [shape: f32[8,128], index: 7, kind: output, shape index: {}]  }
   0x1   :  { %1229 = vset.pattern.permute.xlu0 %v1247_v0  ;;  %v26_v1 = vld [vmem:[%s1475_s0] sm:$0xff]  ;;  %1230 = vset.pattern.permute.xlu1 %v1247_v0  ;;  %v28_v2 = vld [vmem:[%s1475_s0 + $0x10] sm:$0xff]  ;;  %v27_v3 = vld [vmem:[%s1475_s0 + $0x8] sm:$0xff]  ;;  %vm217_vm1 = vcmask 261120   ;;  %v34_v41 = vlaneseq  ;;  %v1251_v45 = vmov 1.0  }
   0x2   :  { %37 = vperm.xlu0 %1229, %v26_v1   ;;  %43 = vperm.xlu1 %1230, %v28_v2   ;;  %v29_v4 = vld [vmem:[%s1475_s0 + $0x18] sm:$0xff]  ;;  %v84_v5 = vld [vmem:[%s1476_s2] sm:$0xff]  ;;  %v85_v6 = vld [vmem:[%s1476_s2 + $0x8] sm:$0xff] }
   0x3   :  { %1170 = vmatprep.subr.bf16.mxu1 %v1248_v7  ;;  %v1138_v8 = vpack.c.bf16 %v85_v6, %v84_v5  ;;  %v86_v9 = vld [vmem:[%s1476_s2 + $0x10] sm:$0xff]  ;;  %v87_v10 = vld [vmem:[%s1476_s2 + $0x18] sm:$0xff]  ;;  %v88_v12 = vld [vmem:[%s1476_s2 + $0x20] sm:$0xff]  ;;  %1047 = vmatprep.mubr.msk.f32.mxu1 %vm1249_vm0, %v1250_v18  ;;  %v35_v42 = vand.u32 127, %v34_v41 }
   0x4   :  { %v1142_v11 = vpack.c.bf16 %v87_v10, %v86_v9  ;;  %v89_v13 = vld [vmem:[%s1476_s2 + $0x28] sm:$0xff]  ;;  %v30_v14 = vld [vmem:[%s1475_s0 + $0x20] sm:$0xff]  ;;  %v214_v21 = vld [vmem:[%s1477_s3 + $0x10] sm:$0xff] }
   0x5   :  { %v31_v15 = vld [vmem:[%s1475_s0 + $0x28] sm:$0xff]  ;;  %1139 = vmatprep.subr.bf16.mxu0 %v1138_v8  ;;  %v212_v16 = vld [vmem:[%s1477_s3] sm:$0xff]  ;;  %v1146_v19 = vpack.c.bf16 %v89_v13, %v88_v12  ;;  %v215_v22 = vld [vmem:[%s1477_s3 + $0x18] sm:$0xff] }
   0x6   :  { %40 = vperm.xlu0 %1229, %v27_v3   ;;  %46 = vperm.xlu1 %1230, %v29_v4   ;;  %v213_v17 = vld [vmem:[%s1477_s3 + $0x8] sm:$0xff]  ;;  %v90_v23 = vld [vmem:[%s1476_s2 + $0x30] sm:$0xff]  ;;  %v91_v24 = vld [vmem:[%s1476_s2 + $0x38] sm:$0xff]  ;;  %v1355_v26 = vpack.c.bf16 %v215_v22, %v214_v21 }
   0x7   :  { %1141 = vmatpush3.bf16.msra.mxu0 %v1138_v8  ;;  %v1337_v20 = vpack.c.bf16 %v213_v17, %v212_v16  ;;  %v32_v25 = vld [vmem:[%s1475_s0 + $0x30] sm:$0xff]  ;;  %v1150_v27 = vpack.c.bf16 %v91_v24, %v90_v23  ;;  %v92_v28 = vld [vmem:[%s1476_s2 + $0x40] sm:$0xff]  ;;  %v93_v29 = vld [vmem:[%s1476_s2 + $0x48] sm:$0xff] }
   0x8   :  { %1143 = vmatprep.subr.bf16.mxu0 %v1142_v11  ;;  %v216_v30 = vld [vmem:[%s1478_s1] sm:$0xff]  ;;  %v1154_v31 = vpack.c.bf16 %v93_v29, %v92_v28  ;;  %v94_v32 = vld [vmem:[%s1476_s2 + $0x50] sm:$0xff]  ;;  %v95_v33 = vld [vmem:[%s1476_s2 + $0x58] sm:$0xff] }
   0x9   :  { %1172 = vmatpush3.bf16.msra.mxu1 %v1337_v20  ;;  %v1158_v34 = vpack.c.bf16 %v95_v33, %v94_v32  ;;  %v96_v35 = vld [vmem:[%s1476_s2 + $0x60] sm:$0xff]  ;;  %v97_v36 = vld [vmem:[%s1476_s2 + $0x68] sm:$0xff]  ;;  %v98_v38 = vld [vmem:[%s1476_s2 + $0x70] sm:$0xff] }
   0xa   :  { %49 = vperm.xlu0 %1229, %v30_v14   ;;  %52 = vperm.xlu1 %1230, %v31_v15   ;;  %v1162_v37 = vpack.c.bf16 %v97_v36, %v96_v35  ;;  %v99_v39 = vld [vmem:[%s1476_s2 + $0x78] sm:$0xff]  ;;  %v1405_v54 = vld [vmem:[%s1479_s4] ss:$0 sm:$0xff]  ;;  %v811_v36 = vld [vmem:[%s1480_s5 + $0x8] sm:$0xff] }
   0xb   :  { %1145 = vmatpush3.bf16.msra.mxu0 %v1142_v11  ;;  %1173 = vmatprep.subr.bf16.mxu1 %v1248_v7  ;;  %v1166_v40 = vpack.c.bf16 %v99_v39, %v98_v38  ;;  %v33_v53 = vld [vmem:[%s1475_s0 + $0x38] sm:$0xff] }
   0xc   :  { %1147 = vmatprep.subr.bf16.mxu0 %v1146_v19  ;;  %v813_v38 = vld [vmem:[%s1480_s5 + $0x18] sm:$0xff] }
   0xd   :  { %1175 = vmatpush3.bf16.msra.mxu1 %v1355_v26 }
   0xe   :  { %55 = vperm.xlu0 %1229, %v32_v25   ;;  %1176 = vmatprep.subr.bf16.mxu1 %v1248_v7 }
   0xf   :  { %1149 = vmatpush3.bf16.msra.mxu0 %v1146_v19  ;;  %58 = vperm.xlu1 %1230, %v33_v53  }
  0x10   :  { %1151 = vmatprep.subr.bf16.mxu0 %v1150_v27  ;;  %1048 = vmatmul.mubr.msk.f32.vlgmr.msra.gmra.mrb[0].mxu1 %vm217_vm1, %v216_v30 }
  0x11   :  { %1178 = vmatpush3.bf16.msra.mxu1 %v1337_v20  ;;  %1058 = vmatprep.mubr.msk.f32.mxu1 %vm1249_vm0, %v1250_v18 }
  0x12   :  { %1179 = vmatprep.subr.bf16.mxu1 %v1248_v7 }
  0x13   :  { %1153 = vmatpush3.bf16.msra.mxu0 %v1150_v27 }
  0x14   :  { %1155 = vmatprep.subr.bf16.mxu0 %v1154_v31 }
  0x15   :  { %1181 = vmatpush3.bf16.msra.mxu1 %v1355_v26 }
  0x16   :  { %1182 = vmatprep.subr.bf16.mxu1 %v1248_v7 }
  0x17   :  { %1157 = vmatpush3.bf16.msra.mxu0 %v1154_v31 }
  0x18   :  { %1159 = vmatprep.subr.bf16.mxu0 %v1158_v34 }
  0x1b   :  { %1161 = vmatpush3.bf16.msra.mxu0 %v1158_v34 }
  0x1c   :  { %1163 = vmatprep.subr.bf16.mxu0 %v1162_v37 }
  0x1f   :  { %1165 = vmatpush3.bf16.msra.mxu0 %v1162_v37 }
  0x20   :  { %1167 = vmatprep.subr.bf16.mxu0 %v1166_v40 }
  0x23   :  { %1169 = vmatpush3.bf16.msra.mxu0 %v1166_v40 }
  0x24   :  { %1200 = vmatprep.subr.bf16.mxu0 %v1248_v7 }
  0x81   :  { %v38_v43 = vpop.permute.xlu0 %37  ;;  %v44_v44 = vpop.permute.xlu1 %43 }
  0x82   :  { %vm60_vm2 = vcmp.eq.s32.totalorder %v35_v42, %v38_v43  ;;  %vm62_vm3 = vcmp.eq.s32.totalorder %v35_v42, %v44_v44 }
  0x83   :  { %1027 = vmatprep.mubr.msk.f32.mxu0 %vm60_vm2, %v1251_v45 }
  0x85   :  { %v41_v46 = vpop.permute.xlu0 %40  ;;  %v47_v47 = vpop.permute.xlu1 %46 }
  0x86   :  { %vm61_vm4 = vcmp.eq.s32.totalorder %v35_v42, %v41_v46  ;;  %vm63_vm5 = vcmp.eq.s32.totalorder %v35_v42, %v47_v47 }
  0x87   :  { %1028 = vmatmul.mubr.msk.f32.vlgmr.msra.gmra.mrb[0].mxu0 %vm61_vm4, %v1251_v45 }
  0x88   :  { %1030 = vmatprep.mubr.msk.f32.mxu0 %vm62_vm3, %v1251_v45  ;;  %1202 = vmatpush3.bf16.msra.mxu0 %v1337_v20 }
  0x89   :  { %v50_v48 = vpop.permute.xlu0 %49  ;;  %v53_v49 = vpop.permute.xlu1 %52  ;;  %1203 = vmatprep.subr.bf16.mxu0 %v1248_v7 }
  0x8a   :  { %vm64_vm6 = vcmp.eq.s32.totalorder %v35_v42, %v50_v48  ;;  %vm65_vm7 = vcmp.eq.s32.totalorder %v35_v42, %v53_v49 }
  0x8b   :  { %1031 = vmatmul.mubr.msk.f32.gmra.mrb[2].mxu0 %vm63_vm5, %v1251_v45 }
  0x8c   :  { %1033 = vmatprep.mubr.msk.f32.mxu0 %vm64_vm6, %v1251_v45  ;;  %1205 = vmatpush3.bf16.msra.mxu0 %v1355_v26 }
  0x8d   :  { %v56_v50 = vpop.permute.xlu0 %55  ;;  %1212 = vmatprep.subr.bf16.mxu0 %v1248_v7 }
  0x8e   :  { %vm66_vm8 = vcmp.eq.s32.totalorder %v35_v42, %v56_v50  ;;  %v59_v60 = vpop.permute.xlu1 %58 }
  0x8f   :  { %1034 = vmatmul.mubr.msk.f32.gmra.mrb[4].mxu0 %vm65_vm7, %v1251_v45  ;;  %vm67_vm9 = vcmp.eq.s32.totalorder %v35_v42, %v59_v60 }
  0x90   :  { %1036 = vmatprep.mubr.msk.f32.mxu0 %vm66_vm8, %v1251_v45 }
  0x93   :  { %1037 = vmatmul.mubr.msk.f32.gmra.mrb[6].mxu0 %vm67_vm9, %v1251_v45  ;;  %v924_v45 = vld [vmem:[%s1481_s6] ss:$0 sm:$0xff] }
  0x94   :  { %1102 = vmatprep.mubr.msk.f32.mxu0 %vm1249_vm0, %v1250_v18 }
  0xe3   :  { %v287_v51 = vpop.f32.mrb[0].mxu1 }
  0xe4   :  { %v1049_v52 = vpop.f32.mrb[1].mxu1 }
 0x15a   :  { %v1029_v55 = vpop.f32.mrb[0].mxu0 }
 0x15b   :  { %v173_v56 = vpop.f32.mrb[1].mxu0  ;;  %v179_v1 = vadd.f32 %v1029_v55, %v1405_v54 }
 0x15c   :  { %v174_v57 = vadd.f32 %v1405_v54, %v173_v56 }
 0x15e   :  { %v288_v58 = vadd.f32 %v287_v51, %v174_v57  ;;  %v1032_v61 = vpop.f32.mrb[2].mxu0 }
 0x15f   :  { %v183_v62 = vpop.f32.mrb[3].mxu0  ;;  %v189_v14 = vadd.f32 %v1032_v61, %v1405_v54 }
 0x160   :  { %1231 = vtanh.f32 %v288_v58  ;;  %v184_v9 = vadd.f32 %v1405_v54, %v183_v62 }
 0x162   :  { %v1035_v63 = vpop.f32.mrb[4].mxu0 }
 0x163   :  { %v193_v0 = vpop.f32.mrb[5].mxu0  ;;  %v199_v27 = vadd.f32 %v1035_v63, %v1405_v54 }
 0x164   :  { %v194_v21 = vadd.f32 %v1405_v54, %v193_v0 }
 0x166   :  { %v1038_v6 = vpop.f32.mrb[6].mxu0 }
 0x167   :  { %v203_v8 = vpop.f32.mrb[7].mxu0  ;;  %v209_v40 = vadd.f32 %v1038_v6, %v1405_v54 }
 0x16a   :  { %v1232_v59 = vpop.eup %1231 }
 0x16b   :  { %1059 = vmatmul.mubr.msk.f32.vlgmr.msra.gmra.mrb[2].mxu1 %vm217_vm1, %v1232_v59 }
 0x16c   :  { %1184 = vmatpush3.bf16.msra.mxu1 %v1337_v20  ;;  %1069 = vmatprep.mubr.msk.f32.mxu1 %vm1249_vm0, %v1250_v18 }
 0x16d   :  { %1185 = vmatprep.subr.bf16.mxu1 %v1248_v7 }
 0x170   :  { %1187 = vmatpush3.bf16.msra.mxu1 %v1355_v26 }
 0x171   :  { %1188 = vmatprep.subr.bf16.mxu1 %v1248_v7 }
 0x23e   :  { %v361_v2 = vpop.f32.mrb[2].mxu1 }
 0x23f   :  { %v362_v3 = vadd.f32 %v361_v2, %v179_v1  ;;  %v1060_v4 = vpop.f32.mrb[3].mxu1 }
 0x241   :  { %1233 = vtanh.f32 %v362_v3 }
 0x24b   :  { %v1234_v5 = vpop.eup %1233 }
 0x24c   :  { %1070 = vmatmul.mubr.msk.f32.vlgmr.msra.gmra.mrb[4].mxu1 %vm217_vm1, %v1234_v5 }
 0x24d   :  { %1190 = vmatpush3.bf16.msra.mxu1 %v1337_v20  ;;  %1080 = vmatprep.mubr.msk.f32.mxu1 %vm1249_vm0, %v1250_v18 }
 0x24e   :  { %1191 = vmatprep.subr.bf16.mxu1 %v1248_v7 }
 0x251   :  { %1193 = vmatpush3.bf16.msra.mxu1 %v1355_v26 }
 0x252   :  { %1194 = vmatprep.subr.bf16.mxu1 %v1248_v7 }
 0x31f   :  { %v435_v10 = vpop.f32.mrb[4].mxu1 }
 0x320   :  { %v436_v11 = vadd.f32 %v435_v10, %v184_v9  ;;  %v1071_v12 = vpop.f32.mrb[5].mxu1 }
 0x322   :  { %1235 = vtanh.f32 %v436_v11 }
 0x32c   :  { %v1236_v13 = vpop.eup %1235 }
 0x32d   :  { %1081 = vmatmul.mubr.msk.f32.vlgmr.msra.gmra.mrb[6].mxu1 %vm217_vm1, %v1236_v13 }
 0x32e   :  { %1196 = vmatpush3.bf16.msra.mxu1 %v1337_v20  ;;  %1091 = vmatprep.mubr.msk.f32.mxu1 %vm1249_vm0, %v1250_v18 }
 0x32f   :  { %1197 = vmatprep.subr.bf16.mxu1 %v1248_v7 }
 0x332   :  { %1199 = vmatpush3.bf16.msra.mxu1 %v1355_v26 }
 0x333   :  { %1206 = vmatprep.subr.bf16.mxu1 %v1248_v7 }
 0x400   :  { %v509_v15 = vpop.f32.mrb[6].mxu1 }
 0x401   :  { %v510_v16 = vadd.f32 %v509_v15, %v189_v14  ;;  %v1082_v17 = vpop.f32.mrb[7].mxu1 }
 0x403   :  { %1237 = vtanh.f32 %v510_v16 }
 0x40d   :  { %v1238_v19 = vpop.eup %1237 }
 0x40e   :  { %1092 = vmatmul.mubr.msk.f32.vlgmr.msra.gmra.mrb[8].mxu1 %vm217_vm1, %v1238_v19 }
 0x40f   :  { %1208 = vmatpush3.bf16.msra.mxu1 %v1337_v20  ;;  %1113 = vmatprep.mubr.msk.f32.mxu1 %vm1249_vm0, %v1250_v18 }
 0x410   :  { %1209 = vmatprep.subr.bf16.mxu1 %v1248_v7 }
 0x413   :  { %1211 = vmatpush3.bf16.msra.mxu1 %v1355_v26 }
 0x414   :  { %1218 = vmatprep.subr.bf16.mxu1 %v1248_v7 }
 0x4e1   :  { %v583_v22 = vpop.f32.mrb[8].mxu1 }
 0x4e2   :  { %v584_v23 = vadd.f32 %v583_v22, %v194_v21  ;;  %v1093_v24 = vpop.f32.mrb[9].mxu1 }
 0x4e4   :  { %1239 = vtanh.f32 %v584_v23 }
 0x4ee   :  { %v1240_v25 = vpop.eup %1239 }
 0x4ef   :  { %1103 = vmatmul.mubr.msk.f32.vlgmr.msra.gmra.mrb[8].mxu0 %vm217_vm1, %v1240_v25 }
 0x4f0   :  { %1214 = vmatpush3.bf16.msra.mxu0 %v1337_v20  ;;  %1124 = vmatprep.mubr.msk.f32.mxu0 %vm1249_vm0, %v1250_v18  ;;  %v204_v20 = vadd.f32 %v1405_v54, %v203_v8 }
 0x4f1   :  { %1215 = vmatprep.subr.bf16.mxu0 %v1248_v7 }
 0x4f4   :  { %1217 = vmatpush3.bf16.msra.mxu0 %v1355_v26  ;;  %v810_v26 = vld [vmem:[%s1480_s5] sm:$0xff] }
 0x4f5   :  { %v1219_v37 = vpack.c.bf16 %v811_v36, %v810_v26 }
 0x5c2   :  { %v657_v28 = vpop.f32.mrb[8].mxu0 }
 0x5c3   :  { %v658_v29 = vadd.f32 %v657_v28, %v199_v27  ;;  %v1104_v30 = vpop.f32.mrb[9].mxu0 }
 0x5c5   :  { %1241 = vtanh.f32 %v658_v29 }
 0x5cf   :  { %v1242_v31 = vpop.eup %1241 }
 0x5d0   :  { %1114 = vmatmul.mubr.msk.f32.vlgmr.msra.gmra.mrb[10].mxu1 %vm217_vm1, %v1242_v31 }
 0x5d1   :  { %1135 = vmatprep.mubr.msk.f32.mxu1 %vm1249_vm0, %v1250_v18  ;;  %v812_v18 = vld [vmem:[%s1480_s5 + $0x10] sm:$0xff]  ;;  %1220 = vmatpush3.bf16.msra.mxu1 %v1219_v37 }
 0x5d2   :  { %v1222_v39 = vpack.c.bf16 %v813_v38, %v812_v18  ;;  %1221 = vmatprep.subr.bf16.mxu1 %v1248_v7 }
 0x5d5   :  { %1223 = vmatpush3.bf16.msra.mxu1 %v1222_v39 }
 0x6a3   :  { %v731_v32 = vpop.f32.mrb[10].mxu1 }
 0x6a4   :  { %v732_v33 = vadd.f32 %v731_v32, %v204_v20  ;;  %v1115_v34 = vpop.f32.mrb[11].mxu1 }
 0x6a6   :  { %1243 = vtanh.f32 %v732_v33 }
 0x6b0   :  { %v1244_v35 = vpop.eup %1243 }
 0x6b1   :  { %1125 = vmatmul.mubr.msk.f32.vlgmr.msra.gmra.mrb[10].mxu0 %vm217_vm1, %v1244_v35 }
 0x784   :  { %v805_v41 = vpop.f32.mrb[10].mxu0 }
 0x785   :  { %v806_v42 = vadd.f32 %v805_v41, %v209_v40  ;;  %v1126_v43 = vpop.f32.mrb[11].mxu0 }
 0x787   :  { %1245 = vtanh.f32 %v806_v42 }
 0x791   :  { %v1246_v44 = vpop.eup %1245 }
 0x792   :  { %1136 = vmatmul.mubr.msk.f32.vlgmr.msra.gmra.mrb[12].mxu1 %vm217_vm1, %v1246_v44 }
 0x865   :  { %v890_v46 = vpop.f32.mrb[12].mxu1 }
 0x866   :  { %v891_v47 = vadd.f32 %v924_v45, %v890_v46  ;;  %v1137_v48 = vpop.f32.mrb[13].mxu1 }
 0x868   :  { %894 = vst [vmem:[%s1482_s7] sm:$0xff] %v891_v47 }

</bundles_post_ra>
